<compile_context>
chip_gen: v5e
topology: v5e:2x2
jax: 0.10.0
libtpu: 0.0.40
codegen_flags: <defaults>
</compile_context>

<pallas_src>
import functools

import jax
import jax.numpy as jnp
from jax import lax
from jax.experimental import pallas as pl
from jax.experimental.pallas import tpu as pltpu


def _block_diag_att(att):
    """[H, D] per-head attention vectors -> [H, H*D] block-diagonal matrix.

    Row h holds att[h] in columns h*D:(h+1)*D, zeros elsewhere, so one
    dot_general against h_all [N, H*D] yields the alphas for all heads at once
    (no per-head M=1 matmuls, no in-kernel transposes).
    """
    h, d = att.shape
    eye = jnp.eye(h, dtype=att.dtype)
    return (eye[:, :, None] * att[None, :, :]).reshape(h, h * d)


def _pick_row_tile(n, max_tile=256):
    """Largest multiple of 8 that divides n and is <= max_tile, else n.

    max_tile=256 keeps per-step VMEM (double-buffered bf16 adj tile + the
    f32 [TILE, N] e/p temporaries + h_all) comfortably inside v7x's 32 MiB
    scoped-VMEM default; raise vmem_limit_bytes if you bump it.
    """
    if n <= max_tile:
        return n
    for t in range(max_tile, 0, -8):
        if n % t == 0:
            return t
    return n


def gat_layer_kernel(x_full_ref, x_tile_ref, w_ref, a_src_ref, a_dst_ref,
                     bias_ref, adj_ref, out_ref, *, heads, out_dim, concat,
                     apply_elu):
    """One row-tile of a GATConv layer (PyG semantics) + optional ELU.

    Grid axis 0 tiles the target nodes (rows of adj / output); source nodes
    (columns of adj) are kept whole so the per-row softmax is exact within one
    invocation.
    """
    # Hoisted loads (JAX does not CSE repeated ref reads in an unrolled loop).
    x_full = x_full_ref[...]            # [N, F_in]      bf16 (all source nodes)
    x_tile = x_tile_ref[...]            # [T, F_in]      bf16 (this tile's targets)
    w = w_ref[...]                      # [F_in, H*D]    bf16
    a_src = a_src_ref[...]              # [H, H*D]       f32 block-diagonal
    a_dst = a_dst_ref[...]              # [H, H*D]       f32 block-diagonal
    bias = bias_ref[...]                # [1, out_cols]  f32
    adj = adj_ref[...]                  # [T, N]         bf16 (0/1)

    # Feature transform: bf16 MXU inputs, f32 accumulation.
    h_all = jnp.dot(x_full, w, preferred_element_type=jnp.float32)   # [N, H*D]
    h_dst = jnp.dot(x_tile, w, preferred_element_type=jnp.float32)   # [T, H*D]

    # All-heads attention coefficients in two small matmuls:
    #   alpha_src_t[h, j] = att_src[h] . (W x_j)   (lane-dense [H, N] row form)
    #   alpha_dst[i, h]   = att_dst[h] . (W x_i)   (column form, this tile only)
    alpha_src_t = lax.dot_general(a_src, h_all, (((1,), (1,)), ((), ())),
                                  preferred_element_type=jnp.float32)  # [H, N]
    alpha_dst = lax.dot_general(h_dst, a_dst, (((1,), (1,)), ((), ())),
                                preferred_element_type=jnp.float32)    # [T, H]

    edge_mask = adj > 0                 # self loops guarantee >=1 edge per row
    neg = jnp.float32(-1e30)
    if concat:
        lane = lax.broadcasted_iota(jnp.int32, (1, heads * out_dim), 1)

    acc = None
    for h in range(heads):              # heads is small & static -> unrolled
        # e[i, j] = LeakyReLU(a_dst.h_i + a_src.h_j), masked to edges j -> i.
        e = alpha_dst[:, h:h + 1] + alpha_src_t[h:h + 1, :]   # [T, N]
        e = jnp.where(e > 0, e, 0.2 * e)                      # negative_slope=0.2
        e = jnp.where(edge_mask, e, neg)

        # Online softmax numerator; normalization deferred past the matmul
        # (one [T, out] scale + EUP reciprocal instead of an NxN divide).
        m = jnp.max(e, axis=-1, keepdims=True)
        p = jnp.exp(e - m)              # masked entries underflow to exactly 0
        denom = jnp.sum(p, axis=-1, keepdims=True)            # >= 1 (self loop)
        # TODO(synk): attention dropout (p=0.6) is training-only; identity in eval.

        if concat:
            # Zero-mask the other heads' columns so each head lands in its own
            # out_dim-wide slice of a single full-width [T, H*D] matmul result
            # (same MXU pass count as a [T, D] result; enables one wide store).
            in_head = (lane >= h * out_dim) & (lane < (h + 1) * out_dim)
            vmat = jnp.where(in_head, h_all, 0.0).astype(jnp.bfloat16)  # [N, H*D]
        else:
            vmat = h_all[:, h * out_dim:(h + 1) * out_dim].astype(jnp.bfloat16)

        contrib = jnp.dot(p.astype(jnp.bfloat16), vmat,
                          preferred_element_type=jnp.float32)
        contrib = contrib * pl.reciprocal(denom, approx=True)
        acc = contrib if acc is None else acc + contrib

    res = acc + bias if concat else acc * jnp.float32(1.0 / heads) + bias
    if apply_elu:
        # F.elu(alpha=1.0).  TODO(synk): expm1 would be marginally more accurate
        # near 0; kept as exp-1 to stay on known-supported Mosaic lowerings.
        res = jnp.where(res > 0, res, jnp.exp(res) - 1.0)

    out_ref[...] = res                  # single full-width store per row tile


def gat_layer(x, w, att_src, att_dst, bias, adj, *, heads, out_dim, concat,
              apply_elu, row_tile=None):
    n, f_in = x.shape
    out_cols = heads * out_dim if concat else out_dim
    tile = _pick_row_tile(n) if row_tile is None else row_tile
    assert n % tile == 0

    # bf16 for MXU-fed operands (f32 accumulation in-kernel); adj is 0/1 so the
    # cast is exact and halves the dominant HBM stream.
    x_lp = x.astype(jnp.bfloat16)
    w_lp = w.astype(jnp.bfloat16)
    adj_lp = adj.astype(jnp.bfloat16)
    a_src = _block_diag_att(att_src.astype(jnp.float32))
    a_dst = _block_diag_att(att_dst.astype(jnp.float32))

    kern = functools.partial(gat_layer_kernel, heads=heads, out_dim=out_dim,
                             concat=concat, apply_elu=apply_elu)
    full = lambda shp: pl.BlockSpec(shp, lambda i: (0, 0))
    return pl.pallas_call(
        kern,
        out_shape=jax.ShapeDtypeStruct((n, out_cols), jnp.float32),
        grid=(n // tile,),
        in_specs=[
            full((n, f_in)),                               # x (all source nodes)
            pl.BlockSpec((tile, f_in), lambda i: (i, 0)),  # x (this tile's targets)
            full(w_lp.shape),
            full(a_src.shape),
            full(a_dst.shape),
            full(bias.shape),
            pl.BlockSpec((tile, n), lambda i: (i, 0)),     # adj row tile (streamed)
        ],
        out_specs=pl.BlockSpec((tile, out_cols), lambda i: (i, 0)),
        # Row tiles are fully independent -> "parallel" lets the runtime shard
        # them across TensorCores (2 TCs on v7x).
        compiler_params=pltpu.CompilerParams(dimension_semantics=("parallel",)),
    )(x_lp, x_lp, w_lp, a_src, a_dst, bias, adj_lp)


def pool_fc_kernel(pool_ref, x_ref, w_ref, b_ref, out_ref):
    """global_mean_pool (as a matmul) + final Linear."""
    pooled = jnp.dot(pool_ref[...], x_ref[...],
                     preferred_element_type=jnp.float32)        # [G, hidden]
    # F.dropout(p=0.5) is the identity in eval mode.
    out_ref[...] = jnp.dot(pooled, w_ref[...],
                           preferred_element_type=jnp.float32) + b_ref[...]


def pool_fc(pool_mat, x, w_fc, b_fc):
    g = pool_mat.shape[0]
    c = w_fc.shape[1]
    spec2d = lambda shp: pl.BlockSpec(shp, lambda i: (0, 0))
    # NOTE: for very small graphs this could be fused into the layer-2 call, but
    # that would force an "arbitrary" (accumulating) row axis there; kept as a
    # separate tiny launch to preserve the parallel row tiling on the attention.
    return pl.pallas_call(
        pool_fc_kernel,
        out_shape=jax.ShapeDtypeStruct((g, c), jnp.float32),
        grid=(1,),
        in_specs=[spec2d(pool_mat.shape), spec2d(x.shape),
                  spec2d(w_fc.shape), spec2d(b_fc.shape)],
        out_specs=spec2d((g, c)),
        compiler_params=pltpu.CompilerParams(dimension_semantics=("arbitrary",)),
    )(pool_mat, x, w_fc, b_fc)


def init_params(key, in_dim, hidden_dim, num_heads, n_classes):
    ks = jax.random.split(key, 8)
    s = 0.2  # deterministic small-scale init
    return {
        # conv1: GATConv(in_dim, hidden_dim, heads=num_heads, concat=True)
        "w1": jax.random.normal(ks[0], (in_dim, num_heads * hidden_dim), jnp.float32) * s,
        "att_src1": jax.random.normal(ks[1], (num_heads, hidden_dim), jnp.float32) * s,
        "att_dst1": jax.random.normal(ks[2], (num_heads, hidden_dim), jnp.float32) * s,
        "b1": jnp.zeros((1, num_heads * hidden_dim), jnp.float32),
        # conv2: GATConv(hidden_dim*num_heads, hidden_dim, heads=1, concat=False)
        "w2": jax.random.normal(ks[3], (num_heads * hidden_dim, hidden_dim), jnp.float32) * s,
        "att_src2": jax.random.normal(ks[4], (1, hidden_dim), jnp.float32) * s,
        "att_dst2": jax.random.normal(ks[5], (1, hidden_dim), jnp.float32) * s,
        "b2": jnp.zeros((1, hidden_dim), jnp.float32),
        # fc: Linear(hidden_dim, n_classes)
        "w_fc": jax.random.normal(ks[6], (hidden_dim, n_classes), jnp.float32) * s,
        "b_fc": jnp.zeros((1, n_classes), jnp.float32),
    }


def gat_classifier_forward(params, x, adj, pool_mat, *, num_heads, hidden_dim):
    h1 = gat_layer(x, params["w1"], params["att_src1"], params["att_dst1"],
                   params["b1"], adj,
                   heads=num_heads, out_dim=hidden_dim, concat=True, apply_elu=True)
    h2 = gat_layer(h1, params["w2"], params["att_src2"], params["att_dst2"],
                   params["b2"], adj,
                   heads=1, out_dim=hidden_dim, concat=False, apply_elu=False)
    return pool_fc(pool_mat, h2, params["w_fc"], params["b_fc"])


if __name__ == "__main__":
    N, IN_DIM, HIDDEN, HEADS, CLASSES, GRAPHS = 16, 8, 8, 4, 4, 2
    key = jax.random.PRNGKey(0)
    k_x, k_e, k_p = jax.random.split(key, 3)

    # node features
    x = jax.random.normal(k_x, (N, IN_DIM), jnp.float32)

    # deterministic random edge_index (edges stay inside each graph of 8 nodes)
    E = 32
    src = jax.random.randint(k_e, (E,), 0, N // 2)
    dst = jax.random.randint(jax.random.fold_in(k_e, 1), (E,), 0, N // 2)
    offset = jnp.where(jnp.arange(E) < E // 2, 0, N // 2)
    src = src + offset
    dst = dst + offset
    edge_index = jnp.stack([src, dst])                # [2, E], PyG convention

    # dense adjacency with self loops: adj[target, source] = 1
    adj = jnp.zeros((N, N), jnp.float32).at[edge_index[1], edge_index[0]].set(1.0)
    adj = jnp.maximum(adj, jnp.eye(N, dtype=jnp.float32))

    # batch vector: nodes 0..7 -> graph 0, nodes 8..15 -> graph 1
    batch = jnp.concatenate([jnp.zeros(N // 2, jnp.int32), jnp.ones(N // 2, jnp.int32)])
    one_hot = (jnp.arange(GRAPHS)[:, None] == batch[None, :]).astype(jnp.float32)
    pool_mat = one_hot / jnp.sum(one_hot, axis=1, keepdims=True)   # [G, N]

    params = init_params(k_p, IN_DIM, HIDDEN, HEADS, CLASSES)

    logits = gat_classifier_forward(params, x, adj, pool_mat,
                                    num_heads=HEADS, hidden_dim=HIDDEN)
    logits = jax.block_until_ready(logits)
    assert logits.shape == (GRAPHS, CLASSES)
    assert bool(jnp.all(jnp.isfinite(logits)))
    print("KERNEL_OK")
</pallas_src>

<mosaic_0001>
module attributes {stable_mosaic.version = 11 : i64} {
  func.func @gat_layer_kernel(%arg0: i32, %arg1: memref<16x8xbf16, #tpu.memory_space<vmem>>, %arg2: memref<16x8xbf16, #tpu.memory_space<vmem>>, %arg3: memref<8x32xbf16, #tpu.memory_space<vmem>>, %arg4: memref<4x32xf32, #tpu.memory_space<vmem>>, %arg5: memref<4x32xf32, #tpu.memory_space<vmem>>, %arg6: memref<1x32xf32, #tpu.memory_space<vmem>>, %arg7: memref<16x16xbf16, #tpu.memory_space<vmem>>, %arg8: memref<16x32xf32, #tpu.memory_space<vmem>>) attributes {dimension_semantics = [#tpu.dimension_semantics<parallel>], iteration_bounds = array<i64: 1>, scalar_prefetch = 0 : i64, scratch_operands = 0 : i64, tpu.core_type = #tpu.core_type<tc>, window_params = [{pipeline_mode = #tpu.pipeline_mode<synchronous>, transform_indices = @transform_0, window_bounds = array<i64: 16, 8>}, {transform_indices = @transform_1, window_bounds = array<i64: 16, 8>}, {pipeline_mode = #tpu.pipeline_mode<synchronous>, transform_indices = @transform_2, window_bounds = array<i64: 8, 32>}, {pipeline_mode = #tpu.pipeline_mode<synchronous>, transform_indices = @transform_3, window_bounds = array<i64: 4, 32>}, {pipeline_mode = #tpu.pipeline_mode<synchronous>, transform_indices = @transform_4, window_bounds = array<i64: 4, 32>}, {pipeline_mode = #tpu.pipeline_mode<synchronous>, transform_indices = @transform_5, window_bounds = array<i64: 1, 32>}, {transform_indices = @transform_6, window_bounds = array<i64: 16, 16>}, {transform_indices = @transform_7, window_bounds = array<i64: 16, 32>}]} {
    %c0 = arith.constant 0 : index
    %c0_0 = arith.constant 0 : index
    %0 = vector.load %arg1[%c0, %c0_0] : memref<16x8xbf16, #tpu.memory_space<vmem>>, vector<16x8xbf16>
    %c0_1 = arith.constant 0 : index
    %c0_2 = arith.constant 0 : index
    %1 = vector.load %arg2[%c0_1, %c0_2] : memref<16x8xbf16, #tpu.memory_space<vmem>>, vector<16x8xbf16>
    %c0_3 = arith.constant 0 : index
    %c0_4 = arith.constant 0 : index
    %2 = vector.load %arg3[%c0_3, %c0_4] : memref<8x32xbf16, #tpu.memory_space<vmem>>, vector<8x32xbf16>
    %c0_5 = arith.constant 0 : index
    %c0_6 = arith.constant 0 : index
    %3 = vector.load %arg4[%c0_5, %c0_6] : memref<4x32xf32, #tpu.memory_space<vmem>>, vector<4x32xf32>
    %c0_7 = arith.constant 0 : index
    %c0_8 = arith.constant 0 : index
    %4 = vector.load %arg5[%c0_7, %c0_8] : memref<4x32xf32, #tpu.memory_space<vmem>>, vector<4x32xf32>
    %c0_9 = arith.constant 0 : index
    %c0_10 = arith.constant 0 : index
    %5 = vector.load %arg6[%c0_9, %c0_10] : memref<1x32xf32, #tpu.memory_space<vmem>>, vector<1x32xf32>
    %c0_11 = arith.constant 0 : index
    %c0_12 = arith.constant 0 : index
    %6 = vector.load %arg7[%c0_11, %c0_12] : memref<16x16xbf16, #tpu.memory_space<vmem>>, vector<16x16xbf16>
    %cst = arith.constant dense<0.000000e+00> : vector<16x32xf32>
    %7 = tpu.matmul %0, %2, %cst {dimension_numbers = #tpu.dot_dimension_numbers<[1], [0], [0], [1], [0, 0, 1, 1], [], []>} : vector<16x8xbf16>, vector<8x32xbf16>, vector<16x32xf32> -> vector<16x32xf32>
    %cst_13 = arith.constant dense<0.000000e+00> : vector<16x32xf32>
    %8 = tpu.matmul %1, %2, %cst_13 {dimension_numbers = #tpu.dot_dimension_numbers<[1], [0], [0], [1], [0, 0, 1, 1], [], []>} : vector<16x8xbf16>, vector<8x32xbf16>, vector<16x32xf32> -> vector<16x32xf32>
    %cst_14 = arith.constant dense<0.000000e+00> : vector<4x16xf32>
    %9 = tpu.matmul %3, %7, %cst_14 {dimension_numbers = #tpu.dot_dimension_numbers<[1], [1], [0], [0], [0, 0, 1, 0], [], []>} : vector<4x32xf32>, vector<16x32xf32>, vector<4x16xf32> -> vector<4x16xf32>
    %cst_15 = arith.constant dense<0.000000e+00> : vector<16x4xf32>
    %10 = tpu.matmul %8, %4, %cst_15 {dimension_numbers = #tpu.dot_dimension_numbers<[1], [1], [0], [0], [0, 0, 1, 0], [], []>} : vector<16x32xf32>, vector<4x32xf32>, vector<16x4xf32> -> vector<16x4xf32>
    %cst_16 = arith.constant 0.000000e+00 : bf16
    %11 = vector.broadcast %cst_16 : bf16 to vector<16x16xbf16>
    %12 = arith.cmpf ogt, %6, %11 : vector<16x16xbf16>
    %13 = tpu.iota {dimensions = array<i32: 1>} : vector<1x32xi32>
    %14 = vector.extract_strided_slice %10 {offsets = [0, 0], sizes = [16, 1], strides = [1, 1]} : vector<16x4xf32> to vector<16x1xf32>
    %15 = vector.extract_strided_slice %9 {offsets = [0, 0], sizes = [1, 16], strides = [1, 1]} : vector<4x16xf32> to vector<1x16xf32>
    %16 = vector.broadcast %14 : vector<16x1xf32> to vector<16x16xf32>
    %17 = vector.broadcast %15 : vector<1x16xf32> to vector<16x16xf32>
    %18 = arith.addf %16, %17 : vector<16x16xf32>
    %cst_17 = arith.constant 0.000000e+00 : f32
    %19 = vector.broadcast %cst_17 : f32 to vector<16x16xf32>
    %20 = arith.cmpf ogt, %18, %19 : vector<16x16xf32>
    %cst_18 = arith.constant 2.000000e-01 : f32
    %21 = vector.broadcast %cst_18 : f32 to vector<16x16xf32>
    %22 = arith.mulf %21, %18 : vector<16x16xf32>
    %23 = arith.select %20, %18, %22 : vector<16x16xi1>, vector<16x16xf32>
    %cst_19 = arith.constant -1.000000e+30 : f32
    %24 = vector.broadcast %cst_19 : f32 to vector<16x16xf32>
    %25 = arith.select %12, %23, %24 : vector<16x16xi1>, vector<16x16xf32>
    %cst_20 = arith.constant dense<0xFF800000> : vector<16xf32>
    %26 = vector.multi_reduction <maximumf>, %25, %cst_20 [1] : vector<16x16xf32> to vector<16xf32>
    %27 = vector.shape_cast %26 : vector<16xf32> to vector<16x1xf32>
    %28 = vector.broadcast %27 : vector<16x1xf32> to vector<16x16xf32>
    %29 = arith.subf %25, %28 : vector<16x16xf32>
    %30 = math.exp %29 : vector<16x16xf32>
    %cst_21 = arith.constant dense<0.000000e+00> : vector<16xf32>
    %31 = vector.multi_reduction <add>, %30, %cst_21 [1] : vector<16x16xf32> to vector<16xf32>
    %32 = vector.shape_cast %31 : vector<16xf32> to vector<16x1xf32>
    %c0_i32 = arith.constant 0 : i32
    %33 = vector.broadcast %c0_i32 : i32 to vector<1x32xi32>
    %34 = arith.cmpi sge, %13, %33 : vector<1x32xi32>
    %c8_i32 = arith.constant 8 : i32
    %35 = vector.broadcast %c8_i32 : i32 to vector<1x32xi32>
    %36 = arith.cmpi slt, %13, %35 : vector<1x32xi32>
    %37 = arith.andi %34, %36 : vector<1x32xi1>
    %cst_22 = arith.constant 0.000000e+00 : f32
    %38 = vector.shape_cast %37 : vector<1x32xi1> to vector<1x32xi1>
    %39 = vector.broadcast %38 : vector<1x32xi1> to vector<16x32xi1>
    %40 = vector.broadcast %cst_22 : f32 to vector<16x32xf32>
    %41 = arith.select %39, %7, %40 : vector<16x32xi1>, vector<16x32xf32>
    %42 = arith.truncf %41 : vector<16x32xf32> to vector<16x32xbf16>
    %43 = arith.truncf %30 : vector<16x16xf32> to vector<16x16xbf16>
    %cst_23 = arith.constant dense<0.000000e+00> : vector<16x32xf32>
    %44 = tpu.matmul %43, %42, %cst_23 {dimension_numbers = #tpu.dot_dimension_numbers<[1], [0], [0], [1], [0, 0, 1, 1], [], []>} : vector<16x16xbf16>, vector<16x32xbf16>, vector<16x32xf32> -> vector<16x32xf32>
    %45 = tpu.reciprocal %32 {approx = true} : vector<16x1xf32> -> vector<16x1xf32>
    %46 = vector.broadcast %45 : vector<16x1xf32> to vector<16x32xf32>
    %47 = arith.mulf %44, %46 : vector<16x32xf32>
    %48 = vector.extract_strided_slice %10 {offsets = [0, 1], sizes = [16, 1], strides = [1, 1]} : vector<16x4xf32> to vector<16x1xf32>
    %49 = vector.extract_strided_slice %9 {offsets = [1, 0], sizes = [1, 16], strides = [1, 1]} : vector<4x16xf32> to vector<1x16xf32>
    %50 = vector.broadcast %48 : vector<16x1xf32> to vector<16x16xf32>
    %51 = vector.broadcast %49 : vector<1x16xf32> to vector<16x16xf32>
    %52 = arith.addf %50, %51 : vector<16x16xf32>
    %cst_24 = arith.constant 0.000000e+00 : f32
    %53 = vector.broadcast %cst_24 : f32 to vector<16x16xf32>
    %54 = arith.cmpf ogt, %52, %53 : vector<16x16xf32>
    %cst_25 = arith.constant 2.000000e-01 : f32
    %55 = vector.broadcast %cst_25 : f32 to vector<16x16xf32>
    %56 = arith.mulf %55, %52 : vector<16x16xf32>
    %57 = arith.select %54, %52, %56 : vector<16x16xi1>, vector<16x16xf32>
    %cst_26 = arith.constant -1.000000e+30 : f32
    %58 = vector.broadcast %cst_26 : f32 to vector<16x16xf32>
    %59 = arith.select %12, %57, %58 : vector<16x16xi1>, vector<16x16xf32>
    %cst_27 = arith.constant dense<0xFF800000> : vector<16xf32>
    %60 = vector.multi_reduction <maximumf>, %59, %cst_27 [1] : vector<16x16xf32> to vector<16xf32>
    %61 = vector.shape_cast %60 : vector<16xf32> to vector<16x1xf32>
    %62 = vector.broadcast %61 : vector<16x1xf32> to vector<16x16xf32>
    %63 = arith.subf %59, %62 : vector<16x16xf32>
    %64 = math.exp %63 : vector<16x16xf32>
    %cst_28 = arith.constant dense<0.000000e+00> : vector<16xf32>
    %65 = vector.multi_reduction <add>, %64, %cst_28 [1] : vector<16x16xf32> to vector<16xf32>
    %66 = vector.shape_cast %65 : vector<16xf32> to vector<16x1xf32>
    %c8_i32_29 = arith.constant 8 : i32
    %67 = vector.broadcast %c8_i32_29 : i32 to vector<1x32xi32>
    %68 = arith.cmpi sge, %13, %67 : vector<1x32xi32>
    %c16_i32 = arith.constant 16 : i32
    %69 = vector.broadcast %c16_i32 : i32 to vector<1x32xi32>
    %70 = arith.cmpi slt, %13, %69 : vector<1x32xi32>
    %71 = arith.andi %68, %70 : vector<1x32xi1>
    %cst_30 = arith.constant 0.000000e+00 : f32
    %72 = vector.shape_cast %71 : vector<1x32xi1> to vector<1x32xi1>
    %73 = vector.broadcast %72 : vector<1x32xi1> to vector<16x32xi1>
    %74 = vector.broadcast %cst_30 : f32 to vector<16x32xf32>
    %75 = arith.select %73, %7, %74 : vector<16x32xi1>, vector<16x32xf32>
    %76 = arith.truncf %75 : vector<16x32xf32> to vector<16x32xbf16>
    %77 = arith.truncf %64 : vector<16x16xf32> to vector<16x16xbf16>
    %cst_31 = arith.constant dense<0.000000e+00> : vector<16x32xf32>
    %78 = tpu.matmul %77, %76, %cst_31 {dimension_numbers = #tpu.dot_dimension_numbers<[1], [0], [0], [1], [0, 0, 1, 1], [], []>} : vector<16x16xbf16>, vector<16x32xbf16>, vector<16x32xf32> -> vector<16x32xf32>
    %79 = tpu.reciprocal %66 {approx = true} : vector<16x1xf32> -> vector<16x1xf32>
    %80 = vector.broadcast %79 : vector<16x1xf32> to vector<16x32xf32>
    %81 = arith.mulf %78, %80 : vector<16x32xf32>
    %82 = arith.addf %47, %81 : vector<16x32xf32>
    %83 = vector.extract_strided_slice %10 {offsets = [0, 2], sizes = [16, 1], strides = [1, 1]} : vector<16x4xf32> to vector<16x1xf32>
    %84 = vector.extract_strided_slice %9 {offsets = [2, 0], sizes = [1, 16], strides = [1, 1]} : vector<4x16xf32> to vector<1x16xf32>
    %85 = vector.broadcast %83 : vector<16x1xf32> to vector<16x16xf32>
    %86 = vector.broadcast %84 : vector<1x16xf32> to vector<16x16xf32>
    %87 = arith.addf %85, %86 : vector<16x16xf32>
    %cst_32 = arith.constant 0.000000e+00 : f32
    %88 = vector.broadcast %cst_32 : f32 to vector<16x16xf32>
    %89 = arith.cmpf ogt, %87, %88 : vector<16x16xf32>
    %cst_33 = arith.constant 2.000000e-01 : f32
    %90 = vector.broadcast %cst_33 : f32 to vector<16x16xf32>
    %91 = arith.mulf %90, %87 : vector<16x16xf32>
    %92 = arith.select %89, %87, %91 : vector<16x16xi1>, vector<16x16xf32>
    %cst_34 = arith.constant -1.000000e+30 : f32
    %93 = vector.broadcast %cst_34 : f32 to vector<16x16xf32>
    %94 = arith.select %12, %92, %93 : vector<16x16xi1>, vector<16x16xf32>
    %cst_35 = arith.constant dense<0xFF800000> : vector<16xf32>
    %95 = vector.multi_reduction <maximumf>, %94, %cst_35 [1] : vector<16x16xf32> to vector<16xf32>
    %96 = vector.shape_cast %95 : vector<16xf32> to vector<16x1xf32>
    %97 = vector.broadcast %96 : vector<16x1xf32> to vector<16x16xf32>
    %98 = arith.subf %94, %97 : vector<16x16xf32>
    %99 = math.exp %98 : vector<16x16xf32>
    %cst_36 = arith.constant dense<0.000000e+00> : vector<16xf32>
    %100 = vector.multi_reduction <add>, %99, %cst_36 [1] : vector<16x16xf32> to vector<16xf32>
    %101 = vector.shape_cast %100 : vector<16xf32> to vector<16x1xf32>
    %c16_i32_37 = arith.constant 16 : i32
    %102 = vector.broadcast %c16_i32_37 : i32 to vector<1x32xi32>
    %103 = arith.cmpi sge, %13, %102 : vector<1x32xi32>
    %c24_i32 = arith.constant 24 : i32
    %104 = vector.broadcast %c24_i32 : i32 to vector<1x32xi32>
    %105 = arith.cmpi slt, %13, %104 : vector<1x32xi32>
    %106 = arith.andi %103, %105 : vector<1x32xi1>
    %cst_38 = arith.constant 0.000000e+00 : f32
    %107 = vector.shape_cast %106 : vector<1x32xi1> to vector<1x32xi1>
    %108 = vector.broadcast %107 : vector<1x32xi1> to vector<16x32xi1>
    %109 = vector.broadcast %cst_38 : f32 to vector<16x32xf32>
    %110 = arith.select %108, %7, %109 : vector<16x32xi1>, vector<16x32xf32>
    %111 = arith.truncf %110 : vector<16x32xf32> to vector<16x32xbf16>
    %112 = arith.truncf %99 : vector<16x16xf32> to vector<16x16xbf16>
    %cst_39 = arith.constant dense<0.000000e+00> : vector<16x32xf32>
    %113 = tpu.matmul %112, %111, %cst_39 {dimension_numbers = #tpu.dot_dimension_numbers<[1], [0], [0], [1], [0, 0, 1, 1], [], []>} : vector<16x16xbf16>, vector<16x32xbf16>, vector<16x32xf32> -> vector<16x32xf32>
    %114 = tpu.reciprocal %101 {approx = true} : vector<16x1xf32> -> vector<16x1xf32>
    %115 = vector.broadcast %114 : vector<16x1xf32> to vector<16x32xf32>
    %116 = arith.mulf %113, %115 : vector<16x32xf32>
    %117 = arith.addf %82, %116 : vector<16x32xf32>
    %118 = vector.extract_strided_slice %10 {offsets = [0, 3], sizes = [16, 1], strides = [1, 1]} : vector<16x4xf32> to vector<16x1xf32>
    %119 = vector.extract_strided_slice %9 {offsets = [3, 0], sizes = [1, 16], strides = [1, 1]} : vector<4x16xf32> to vector<1x16xf32>
    %120 = vector.broadcast %118 : vector<16x1xf32> to vector<16x16xf32>
    %121 = vector.broadcast %119 : vector<1x16xf32> to vector<16x16xf32>
    %122 = arith.addf %120, %121 : vector<16x16xf32>
    %cst_40 = arith.constant 0.000000e+00 : f32
    %123 = vector.broadcast %cst_40 : f32 to vector<16x16xf32>
    %124 = arith.cmpf ogt, %122, %123 : vector<16x16xf32>
    %cst_41 = arith.constant 2.000000e-01 : f32
    %125 = vector.broadcast %cst_41 : f32 to vector<16x16xf32>
    %126 = arith.mulf %125, %122 : vector<16x16xf32>
    %127 = arith.select %124, %122, %126 : vector<16x16xi1>, vector<16x16xf32>
    %cst_42 = arith.constant -1.000000e+30 : f32
    %128 = vector.broadcast %cst_42 : f32 to vector<16x16xf32>
    %129 = arith.select %12, %127, %128 : vector<16x16xi1>, vector<16x16xf32>
    %cst_43 = arith.constant dense<0xFF800000> : vector<16xf32>
    %130 = vector.multi_reduction <maximumf>, %129, %cst_43 [1] : vector<16x16xf32> to vector<16xf32>
    %131 = vector.shape_cast %130 : vector<16xf32> to vector<16x1xf32>
    %132 = vector.broadcast %131 : vector<16x1xf32> to vector<16x16xf32>
    %133 = arith.subf %129, %132 : vector<16x16xf32>
    %134 = math.exp %133 : vector<16x16xf32>
    %cst_44 = arith.constant dense<0.000000e+00> : vector<16xf32>
    %135 = vector.multi_reduction <add>, %134, %cst_44 [1] : vector<16x16xf32> to vector<16xf32>
    %136 = vector.shape_cast %135 : vector<16xf32> to vector<16x1xf32>
    %c24_i32_45 = arith.constant 24 : i32
    %137 = vector.broadcast %c24_i32_45 : i32 to vector<1x32xi32>
    %138 = arith.cmpi sge, %13, %137 : vector<1x32xi32>
    %c32_i32 = arith.constant 32 : i32
    %139 = vector.broadcast %c32_i32 : i32 to vector<1x32xi32>
    %140 = arith.cmpi slt, %13, %139 : vector<1x32xi32>
    %141 = arith.andi %138, %140 : vector<1x32xi1>
    %cst_46 = arith.constant 0.000000e+00 : f32
    %142 = vector.shape_cast %141 : vector<1x32xi1> to vector<1x32xi1>
    %143 = vector.broadcast %142 : vector<1x32xi1> to vector<16x32xi1>
    %144 = vector.broadcast %cst_46 : f32 to vector<16x32xf32>
    %145 = arith.select %143, %7, %144 : vector<16x32xi1>, vector<16x32xf32>
    %146 = arith.truncf %145 : vector<16x32xf32> to vector<16x32xbf16>
    %147 = arith.truncf %134 : vector<16x16xf32> to vector<16x16xbf16>
    %cst_47 = arith.constant dense<0.000000e+00> : vector<16x32xf32>
    %148 = tpu.matmul %147, %146, %cst_47 {dimension_numbers = #tpu.dot_dimension_numbers<[1], [0], [0], [1], [0, 0, 1, 1], [], []>} : vector<16x16xbf16>, vector<16x32xbf16>, vector<16x32xf32> -> vector<16x32xf32>
    %149 = tpu.reciprocal %136 {approx = true} : vector<16x1xf32> -> vector<16x1xf32>
    %150 = vector.broadcast %149 : vector<16x1xf32> to vector<16x32xf32>
    %151 = arith.mulf %148, %150 : vector<16x32xf32>
    %152 = arith.addf %117, %151 : vector<16x32xf32>
    %153 = vector.broadcast %5 : vector<1x32xf32> to vector<16x32xf32>
    %154 = arith.addf %152, %153 : vector<16x32xf32>
    %cst_48 = arith.constant 0.000000e+00 : f32
    %155 = vector.broadcast %cst_48 : f32 to vector<16x32xf32>
    %156 = arith.cmpf ogt, %154, %155 : vector<16x32xf32>
    %157 = math.exp %154 : vector<16x32xf32>
    %cst_49 = arith.constant 1.000000e+00 : f32
    %158 = vector.broadcast %cst_49 : f32 to vector<16x32xf32>
    %159 = arith.subf %157, %158 : vector<16x32xf32>
    %160 = arith.select %156, %154, %159 : vector<16x32xi1>, vector<16x32xf32>
    %c0_50 = arith.constant 0 : index
    %c0_51 = arith.constant 0 : index
    %161 = vector.load %arg8[%c0_50, %c0_51] : memref<16x32xf32, #tpu.memory_space<vmem>>, vector<16x32xf32>
    tpu.vector_store %arg8[%c0_50, %c0_51], %160 {strides = array<i32>} : memref<16x32xf32, #tpu.memory_space<vmem>>, vector<16x32xf32>,
    return
  }
  func.func @transform_0(%arg0: i32) -> (i32, i32) {
    %c0_i32 = arith.constant 0 : i32
    %c0_i32_0 = arith.constant 0 : i32
    %c0_i32_1 = arith.constant 0 : i32
    return %c0_i32, %c0_i32_0 : i32, i32
  }
  func.func @transform_1(%arg0: i32) -> (i32, i32) {
    %c0_i32 = arith.constant 0 : i32
    %c0_i32_0 = arith.constant 0 : i32
    return %arg0, %c0_i32 : i32, i32
  }
  func.func @transform_2(%arg0: i32) -> (i32, i32) {
    %c0_i32 = arith.constant 0 : i32
    %c0_i32_0 = arith.constant 0 : i32
    %c0_i32_1 = arith.constant 0 : i32
    return %c0_i32, %c0_i32_0 : i32, i32
  }
  func.func @transform_3(%arg0: i32) -> (i32, i32) {
    %c0_i32 = arith.constant 0 : i32
    %c0_i32_0 = arith.constant 0 : i32
    %c0_i32_1 = arith.constant 0 : i32
    return %c0_i32, %c0_i32_0 : i32, i32
  }
  func.func @transform_4(%arg0: i32) -> (i32, i32) {
    %c0_i32 = arith.constant 0 : i32
    %c0_i32_0 = arith.constant 0 : i32
    %c0_i32_1 = arith.constant 0 : i32
    return %c0_i32, %c0_i32_0 : i32, i32
  }
  func.func @transform_5(%arg0: i32) -> (i32, i32) {
    %c0_i32 = arith.constant 0 : i32
    %c0_i32_0 = arith.constant 0 : i32
    %c0_i32_1 = arith.constant 0 : i32
    return %c0_i32, %c0_i32_0 : i32, i32
  }
  func.func @transform_6(%arg0: i32) -> (i32, i32) {
    %c0_i32 = arith.constant 0 : i32
    %c0_i32_0 = arith.constant 0 : i32
    return %arg0, %c0_i32 : i32, i32
  }
  func.func @transform_7(%arg0: i32) -> (i32, i32) {
    %c0_i32 = arith.constant 0 : i32
    %c0_i32_0 = arith.constant 0 : i32
    return %arg0, %c0_i32 : i32, i32
  }
}

</mosaic_0001>

<bundles_post_ra>
// kernel: tpu_custom_call.1
= control target key start
LH: loop header
LB: loop body
LE: loop exit
PB: predicated region body
PF: predicated region fallthrough
CT: control target
= control target key end

     0   :  { %vm47_vm0 = vcmask 1043456   ;;  %vm87_vm1 = vcmask 261120   ;;  %vm43_vm2 = vcmask 64512   ;;  %s710_s0 = inlined_call_operand.vmem [shape: bf16[16,8], index: 0, kind: input, shape index: {}]   ;;  %s711_s1 = inlined_call_operand.vmem [shape: bf16[16,8], index: 1, kind: input, shape index: {}]   ;;  %s712_s2 = inlined_call_operand.vmem [shape: bf16[8,32], index: 2, kind: input, shape index: {}]   ;;  %s713_s3 = inlined_call_operand.vmem [shape: f32[4,32], index: 3, kind: input, shape index: {}]   ;;  %s714_s4 = inlined_call_operand.vmem [shape: f32[4,32], index: 4, kind: input, shape index: {}]   ;;  %s715_s5 = inlined_call_operand.vmem [shape: f32[1,32], index: 5, kind: input, shape index: {}]   ;;  %s716_s6 = inlined_call_operand.vmem [shape: bf16[16,16], index: 6, kind: input, shape index: {}]   ;;  %s717_s7 = inlined_call_operand.hbm [shape: f32[16,32], index: 7, kind: output, shape index: {}]  }
   0x1   :  { %v32_v0 = vld [vmem:[%s712_s2] sm:$0xf] }
   0x2   :  { %v502_v1 = vld [vmem:[%s711_s1] sm:$0xff]  ;;  %v49_v3 = vsel %vm47_vm0, %v32_v0, 0 }
   0x3   :  { %v501_v2 = vld [vmem:[%s710_s0] sm:$0xff]  ;;  %80 = vmatpush.bf16.msra.mxu1 %v49_v3  ;;  %58 = vmatpush.bf16.msra.mxu0 %v49_v3 }
   0x4   :  { %v34_v4 = vld [vmem:[%s714_s4] sm:$0xf] }
   0x5   :  { %12 = vsyncpa [#allocation3], 0  ;;  %480 = vmatpush.xpose.msk.msra.mxu3 %vm87_vm1, %v34_v4  ;;  %v583_v5 = vmov 3   ;;  %v584_v6 = vmov 1   ;;  %v585_v7 = vmov 0   ;;  %v153_v8 = vlaneseq  ;;  %v504_v24 = vld [vmem:[%s716_s6] sm:$0xff]  }
   0x6   :  { %476 = vmatmul.msk.bf16.vlgmr.msra.gmra.mxu1 %vm43_vm2, %v502_v1  ;;  %471 = vmatmul.msk.bf16.vlgmr.msra.gmra.mxu0 %vm43_vm2, %v501_v2  ;;  %v33_v15 = vld [vmem:[%s713_s3] sm:$0xf]  ;;  %v586_v18 = vmov 2   ;;  %v505_v28 = vunpack.c.l.bf16 %v504_v24  ;;  %v506_v44 = vunpack.c.h.bf16 %v504_v24  ;;  %s455_s12 = sshll.u32 %s717_s7, 4  ;;  %s588_s13 = smov 128   ;;  %s456_s12 = int_to_ptr.hbm [resolvable:$true] %s455_s12 }
   0x7   :  { %515 = vset.pattern.permute.xlu1 %v583_v5  ;;  %516 = vset.pattern.permute.xlu2 %v584_v6  ;;  %v154_v9 = vand.u32 127, %v153_v8  ;;  %s589_s14 = smov 8  }
   0x8   :  { %514 = vset.pattern.permute.xlu0 %v585_v7 }
   0x9   :  { %vm262_vm3 = vcmp.ge.s32.totalorder %v154_v9, 8  ;;  %vm263_vm4 = vcmp.lt.s32.totalorder %v154_v9, 16  ;;  %vm331_vm5 = vcmp.ge.s32.totalorder %v154_v9, 16  ;;  %vm332_vm6 = vcmp.lt.s32.totalorder %v154_v9, 24 }
   0xa   :  { %vm400_vm7 = vcmp.ge.s32.totalorder %v154_v9, 24  ;;  %vm401_vm8 = vcmp.lt.s32.totalorder %v154_v9, 32  ;;  %vm264_vm9 = vmand %vm262_vm3, %vm263_vm4  ;;  %vm196_vm13 = vcmp.lt.s32.totalorder %v154_v9, 8  ;;  %vm654_vm4 = vcmp.gt.f32.partialorder %v505_v28, 0.0 }
   0xb   :  { %vm333_vm10 = vmand %vm331_vm5, %vm332_vm6  ;;  %vm176_vm5 = vcmask 130048  }
   0xc   :  { %vm402_vm11 = vmand %vm400_vm7, %vm401_vm8  ;;  %vm669_vm8 = vcmp.gt.f32.partialorder %v506_v44, 0.0 }
   0xd   :  { %vm487_vm12 = vmpackc.low %vm264_vm9, %vm264_vm9 }
   0xe   :  { %vm491_vm14 = vmpackc.low %vm333_vm10, %vm333_vm10 }
   0xf   :  { %vm495_vm15 = vmpackc.low %vm402_vm11, %vm402_vm11 }
  0x10   :  { %vm483_vm0 = vmpackc.low %vm196_vm13, %vm196_vm13 }
  0x83   :  { %v82_v10 = vpop.f32.mrf.mxu1  ;;  %v60_v11 = vpop.f32.mrf.mxu0 }
  0x84   :  { %481 = vmatmul.msk.f32.vlgmr.msra.gmra.mxu3 %vm87_vm1, %v82_v10 }
  0x8b   :  { %v84_v12 = vpop.f32.mrf.mxu1  ;;  %v62_v13 = vpop.f32.mrf.mxu0 }
  0x8c   :  { %482 = vmatmul.msk.f32.gmra.mxu3 %vm87_vm1, %v84_v12  ;;  %v484_v14 = vpack.c.bf16 %v62_v13, %v60_v11  ;;  %477 = vmatpush.xpose.msk.msra.mxu2 %vm87_vm1, %v62_v13 }
  0x8e   :  { %489 = vmatpush.bf16.msk.msrb.mxu0 %vm487_vm12, %v484_v14  ;;  %493 = vmatpush.bf16.msk.msrb.mxu1 %vm491_vm14, %v484_v14 }
  0x8f   :  { %497 = vmatpush.bf16.msk.msrb.mxu3 %vm495_vm15, %v484_v14 }
  0x90   :  { %478 = vmatpush.xpose.msk.msra.mxu2 %vm87_vm1, %v60_v11 }
  0x93   :  { %479 = vmatmul.msk.f32.vlgmr.msra.gmra.mxu2 %vm87_vm1, %v33_v15 }
  0x94   :  { %485 = vmatpush.bf16.msk.msrb.mxu2 %vm483_vm0, %v484_v14 }
 0x107   :  { %v143_v16 = vpop.f32.mrf.mxu3 }
 0x108   :  { %226 = vperm.xlu2 %516, %v143_v16   ;;  %364 = vperm.xlu1 %515, %v143_v16  }
 0x109   :  { %157 = vperm.xlu0 %514, %v143_v16  }
 0x10f   :  { %v146_v17 = vpop.f32.mrf.mxu3 }
 0x110   :  { %230 = vperm.xlu2 %516, %v146_v17   ;;  %368 = vperm.xlu1 %515, %v146_v17  }
 0x111   :  { %162 = vperm.xlu0 %514, %v146_v17  }
 0x116   :  { %v114_v19 = vpop.f32.mrf.mxu2 }
 0x117   :  { %v371_v21 = vperm.slane %v114_v19, 3  ;;  %v233_v22 = vperm.slane %v114_v19, 1  ;;  %v165_v23 = vperm.slane %v114_v19, 0  ;;  %v302_v58 = vperm.slane %v114_v19, 2 }
 0x118   :  { %518 = vset.pattern.permute.xlu1 %v586_v18 }
 0x119   :  { %517 = vset.pattern.permute.xlu0 %v586_v18  ;;  %299 = vperm.xlu1 %518, %v146_v17  }
 0x11a   :  { %295 = vperm.xlu0 %517, %v143_v16  }
 0x122   :  { %519 = vset.pattern.permute.xlu0 %v583_v5 }
 0x162   :  { %v227_v20 = vpop.permute.xlu2 %226 }
 0x163   :  { %v234_v29 = vadd.f32 %v233_v22, %v227_v20 }
 0x165   :  { %v238_v35 = vmul.f32 0.2, %v234_v29  ;;  %vm236_vm6 = vcmp.gt.f32.partialorder %v234_v29, 0.0 }
 0x167   :  { %v240_v48 = vsel %vm236_vm6, %v234_v29, %v238_v35 }
 0x168   :  { %v242_v50 = vsel %vm654_vm4, %v240_v48, -1e+30 }
 0x169   :  { %v244_v57 = vsel %vm176_vm5, %v242_v50, -inf }
 0x16a   :  { %v231_v38 = vpop.permute.xlu2 %230 }
 0x16b   :  { %v235_v45 = vadd.f32 %v233_v22, %v231_v38 }
 0x16d   :  { %v239_v51 = vmul.f32 0.2, %v235_v45  ;;  %vm237_vm9 = vcmp.gt.f32.partialorder %v235_v45, 0.0 }
 0x16f   :  { %v241_v62 = vsel %vm237_vm9, %v235_v45, %v239_v51 }
 0x170   :  { %v243_v2 = vsel %vm669_vm8, %v241_v62, -1e+30 }
 0x171   :  { %v247_v7 = vsel %vm176_vm5, %v243_v2, -inf }
 0x17a   :  { %v365_v25 = vpop.permute.xlu1 %364 }
 0x17b   :  { %v372_v26 = vadd.f32 %v371_v21, %v365_v25  ;;  %v158_v27 = vpop.permute.xlu0 %157 }
 0x17c   :  { %v166_v30 = vadd.f32 %v165_v23, %v158_v27 }
 0x17d   :  { %v376_v31 = vmul.f32 0.2, %v372_v26  ;;  %vm374_vm2 = vcmp.gt.f32.partialorder %v372_v26, 0.0 }
 0x17e   :  { %v170_v32 = vmul.f32 0.2, %v166_v30  ;;  %vm168_vm3 = vcmp.gt.f32.partialorder %v166_v30, 0.0 }
 0x17f   :  { %v378_v34 = vsel %vm374_vm2, %v372_v26, %v376_v31 }
 0x180   :  { %v660_v36 = vsel %vm654_vm4, %v378_v34, -1e+30  ;;  %v172_v37 = vsel %vm168_vm3, %v166_v30, %v170_v32 }
 0x181   :  { %v382_v39 = vsel %vm176_vm5, %v660_v36, -inf  ;;  %v174_v40 = vsel %vm654_vm4, %v172_v37, -1e+30 }
 0x182   :  { %v369_v41 = vpop.permute.xlu1 %368  ;;  %383 = vmax.xlane.f32.xlu0 %v382_v39  ;;  %v177_v42 = vsel %vm176_vm5, %v174_v40, -inf }
 0x183   :  { %v163_v43 = vpop.permute.xlu0 %162  ;;  %178 = vmax.xlane.f32.xlu2 %v177_v42  ;;  %v373_v46 = vadd.f32 %v371_v21, %v369_v41 }
 0x184   :  { %v167_v47 = vadd.f32 %v165_v23, %v163_v43 }
 0x185   :  { %v377_v52 = vmul.f32 0.2, %v373_v46  ;;  %vm375_vm10 = vcmp.gt.f32.partialorder %v373_v46, 0.0 }
 0x186   :  { %v171_v49 = vmul.f32 0.2, %v167_v47  ;;  %vm169_vm7 = vcmp.gt.f32.partialorder %v167_v47, 0.0 }
 0x187   :  { %v379_v63 = vsel %vm375_vm10, %v373_v46, %v377_v52 }
 0x188   :  { %v173_v54 = vsel %vm169_vm7, %v167_v47, %v171_v49  ;;  %v381_v3 = vsel %vm669_vm8, %v379_v63, -1e+30 }
 0x189   :  { %v175_v55 = vsel %vm669_vm8, %v173_v54, -1e+30  ;;  %v385_v8 = vsel %vm176_vm5, %v381_v3, -inf }
 0x18a   :  { %v180_v56 = vsel %vm176_vm5, %v175_v55, -inf }
 0x18b   :  { %181 = vmax.xlane.f32.xlu1 %v180_v56  ;;  %245 = vmax.xlane.f32.xlu2 %v244_v57  ;;  %v300_v59 = vpop.permute.xlu1 %299 }
 0x18c   :  { %v304_v60 = vadd.f32 %v302_v58, %v300_v59  ;;  %v296_v61 = vpop.permute.xlu0 %295 }
 0x18d   :  { %v303_v0 = vadd.f32 %v302_v58, %v296_v61 }
 0x18e   :  { %v308_v1 = vmul.f32 0.2, %v304_v60  ;;  %vm306_vm11 = vcmp.gt.f32.partialorder %v304_v60, 0.0 }
 0x18f   :  { %v307_v4 = vmul.f32 0.2, %v303_v0  ;;  %vm305_vm12 = vcmp.gt.f32.partialorder %v303_v0, 0.0 }
 0x190   :  { %v310_v5 = vsel %vm306_vm11, %v304_v60, %v308_v1 }
 0x191   :  { %v312_v6 = vsel %vm669_vm8, %v310_v5, -1e+30  ;;  %v309_v10 = vsel %vm305_vm12, %v303_v0, %v307_v4 }
 0x192   :  { %v316_v9 = vsel %vm176_vm5, %v312_v6, -inf  ;;  %v311_v11 = vsel %vm654_vm4, %v309_v10, -1e+30 }
 0x193   :  { %248 = vmax.xlane.f32.xlu1 %v247_v7  ;;  %386 = vmax.xlane.f32.xlu2 %v385_v8  ;;  %v313_v12 = vsel %vm176_vm5, %v311_v11, -inf }
 0x194   :  { %317 = vmax.xlane.f32.xlu0 %v316_v9 }
 0x19b   :  { %314 = vmax.xlane.f32.xlu2 %v313_v12 }
 0x1f5   :  { %v384_v18 = vpop.xlane.xlu0 %383 }
 0x1f6   :  { %v179_v13 = vpop.xlane.xlu2 %178  ;;  %v388_v24 = vsub.f32 %v660_v36, %v384_v18 }
 0x1f7   :  { %v183_v14 = vsub.f32 %v174_v40, %v179_v13 }
 0x1f8   :  { %v390_v26 = vmul.f32 1.442695, %v388_v24 }
 0x1f9   :  { %v185_v15 = vmul.f32 1.442695, %v183_v14  ;;  %v520_v14 = vld [vmem:[%s715_s5] ss:$0 sm:$0xff]  ;;  %s587_s5 = smov [#allocation2]  }
 0x1fa   :  { %s453_s9 = sshll.u32 %s587_s5, 4  ;;  %s454_s9 = int_to_ptr.vmem [resolvable:$true] %s453_s9 }
 0x1fb   :  { %521 = vpow2.f32 %v185_v15 }
 0x1fe   :  { %v182_v16 = vpop.xlane.xlu1 %181  ;;  %v246_v17 = vpop.xlane.xlu2 %245 }
 0x1ff   :  { %v184_v19 = vsub.f32 %v175_v55, %v182_v16  ;;  %v250_v20 = vsub.f32 %v242_v50, %v246_v17 }
 0x201   :  { %v522_v21 = vpop.eup %521  ;;  %v187_v22 = vmul.f32 1.442695, %v184_v19  ;;  %v252_v23 = vmul.f32 1.442695, %v250_v20 }
 0x202   :  { %v189_v25 = vsel %vm176_vm5, %v522_v21, 0.0 }
 0x203   :  { %523 = vpow2.f32 %v187_v22  ;;  %190 = vadd.xlane.f32.xlu1 %v189_v25 }
 0x204   :  { %525 = vpow2.f32 %v252_v23 }
 0x205   :  { %527 = vpow2.f32 %v390_v26 }
 0x206   :  { %v249_v27 = vpop.xlane.xlu1 %248  ;;  %v387_v28 = vpop.xlane.xlu2 %386 }
 0x207   :  { %v251_v29 = vsub.f32 %v243_v2, %v249_v27  ;;  %v389_v30 = vsub.f32 %v381_v3, %v387_v28  ;;  %v318_v31 = vpop.xlane.xlu0 %317 }
 0x208   :  { %v320_v32 = vsub.f32 %v312_v6, %v318_v31 }
 0x209   :  { %v524_v33 = vpop.eup %523  ;;  %v254_v34 = vmul.f32 1.442695, %v251_v29  ;;  %v392_v35 = vmul.f32 1.442695, %v389_v30 }
 0x20a   :  { %v526_v37 = vpop.eup %525  ;;  %v323_v38 = vmul.f32 1.442695, %v320_v32  ;;  %v203_v39 = vpack.c.bf16 %v524_v33, %v522_v21  ;;  %v192_v55 = vsel %vm176_vm5, %v524_v33, 0.0 }
 0x20b   :  { %529 = vpow2.f32 %v254_v34  ;;  %v256_v36 = vsel %vm176_vm5, %v526_v37, 0.0  ;;  %v528_v42 = vpop.eup %527 }
 0x20c   :  { %531 = vpow2.f32 %v392_v35  ;;  %257 = vadd.xlane.f32.xlu0 %v256_v36  ;;  %486 = vmatmul.msk.bf16.vlgmr.msrb.gmra.mxu2 %vm176_vm5, %v203_v39  ;;  %v394_v52 = vsel %vm176_vm5, %v528_v42, 0.0 }
 0x20d   :  { %533 = vpow2.f32 %v323_v38 }
 0x20e   :  { %v315_v40 = vpop.xlane.xlu2 %314 }
 0x20f   :  { %v319_v41 = vsub.f32 %v311_v11, %v315_v40 }
 0x211   :  { %v530_v43 = vpop.eup %529  ;;  %v321_v44 = vmul.f32 1.442695, %v319_v41 }
 0x212   :  { %v532_v45 = vpop.eup %531  ;;  %v259_v46 = vsel %vm176_vm5, %v530_v43, 0.0  ;;  %v270_v47 = vpack.c.bf16 %v530_v43, %v526_v37 }
 0x213   :  { %v534_v48 = vpop.eup %533  ;;  %535 = vpow2.f32 %v321_v44  ;;  %260 = vadd.xlane.f32.xlu1 %v259_v46  ;;  %v408_v49 = vpack.c.bf16 %v532_v45, %v528_v42  ;;  %v397_v56 = vsel %vm176_vm5, %v532_v45, 0.0 }
 0x214   :  { %490 = vmatmul.msk.bf16.vlgmr.msrb.gmra.mxu0 %vm176_vm5, %v270_v47  ;;  %v328_v50 = vsel %vm176_vm5, %v534_v48, 0.0 }
 0x215   :  { %329 = vadd.xlane.f32.xlu0 %v328_v50  ;;  %498 = vmatmul.msk.bf16.vlgmr.msrb.gmra.mxu3 %vm176_vm5, %v408_v49 }
 0x219   :  { %v536_v51 = vpop.eup %535 }
 0x21a   :  { %v325_v53 = vsel %vm176_vm5, %v536_v51, 0.0  ;;  %v339_v54 = vpack.c.bf16 %v534_v48, %v536_v51 }
 0x21b   :  { %395 = vadd.xlane.f32.xlu1 %v394_v52  ;;  %326 = vadd.xlane.f32.xlu2 %v325_v53 }
 0x21c   :  { %494 = vmatmul.msk.bf16.vlgmr.msrb.gmra.mxu1 %vm176_vm5, %v339_v54 }
 0x223   :  { %193 = vadd.xlane.f32.xlu2 %v192_v55 }
 0x22b   :  { %398 = vadd.xlane.f32.xlu2 %v397_v56 }
 0x276   :  { %v191_v57 = vpop.xlane.xlu1 %190 }
 0x27f   :  { %v258_v59 = vpop.xlane.xlu0 %257 }
 0x280   :  { %537 = vrcp.f32 %v258_v59 }
 0x281   :  { %539 = vrcp.f32 %v191_v57 }
 0x286   :  { %v261_v58 = vpop.xlane.xlu1 %260  ;;  %v538_v63 = vpop.eup %537 }
 0x287   :  { %v540_v3 = vpop.eup %539 }
 0x288   :  { %v330_v4 = vpop.xlane.xlu0 %329 }
 0x28e   :  { %v327_v60 = vpop.xlane.xlu2 %326  ;;  %v396_v61 = vpop.xlane.xlu1 %395 }
 0x28f   :  { %541 = vrcp.f32 %v327_v60  ;;  %v216_v0 = vpop.f32.mrf.mxu2 }
 0x290   :  { %543 = vrcp.f32 %v396_v61  ;;  %v223_v5 = vmul.f32 %v540_v3, %v216_v0 }
 0x291   :  { %v283_v62 = vpop.f32.mrf.mxu0 }
 0x292   :  { %v290_v1 = vmul.f32 %v538_v63, %v283_v62 }
 0x294   :  { %v292_v9 = vadd.f32 %v290_v1, %v223_v5 }
 0x295   :  { %v542_v6 = vpop.eup %541 }
 0x296   :  { %v194_v2 = vpop.xlane.xlu2 %193  ;;  %v544_v11 = vpop.eup %543 }
 0x297   :  { %545 = vrcp.f32 %v194_v2  ;;  %v218_v18 = vpop.f32.mrf.mxu2 }
 0x298   :  { %v421_v7 = vpop.f32.mrf.mxu3  ;;  %547 = vrcp.f32 %v261_v58 }
 0x299   :  { %v352_v8 = vpop.f32.mrf.mxu1  ;;  %549 = vrcp.f32 %v330_v4  ;;  %v428_v12 = vmul.f32 %v544_v11, %v421_v7  ;;  %v285_v19 = vpop.f32.mrf.mxu0 }
 0x29a   :  { %v359_v10 = vmul.f32 %v542_v6, %v352_v8 }
 0x29c   :  { %v361_v13 = vadd.f32 %v359_v10, %v292_v9 }
 0x29d   :  { %v546_v15 = vpop.eup %545 }
 0x29e   :  { %v430_v16 = vadd.f32 %v428_v12, %v361_v13  ;;  %v399_v17 = vpop.xlane.xlu2 %398  ;;  %v548_v20 = vpop.eup %547  ;;  %v224_v21 = vmul.f32 %v546_v15, %v218_v18 }
 0x29f   :  { %551 = vrcp.f32 %v399_v17  ;;  %v550_v23 = vpop.eup %549  ;;  %v291_v25 = vmul.f32 %v548_v20, %v285_v19 }
 0x2a0   :  { %v435_v22 = vadd.f32 %v520_v14, %v430_v16  ;;  %v423_v30 = vpop.f32.mrf.mxu3 }
 0x2a1   :  { %v354_v24 = vpop.f32.mrf.mxu1  ;;  %v293_v28 = vadd.f32 %v291_v25, %v224_v21 }
 0x2a2   :  { %v439_v26 = vmul.f32 1.442695, %v435_v22  ;;  %v360_v27 = vmul.f32 %v550_v23, %v354_v24  ;;  %vm437_vm13 = vcmp.gt.f32.partialorder %v435_v22, 0.0 }
 0x2a4   :  { %553 = vpow2.f32 %v439_v26  ;;  %v362_v32 = vadd.f32 %v360_v27, %v293_v28 }
 0x2a5   :  { %v552_v29 = vpop.eup %551 }
 0x2a6   :  { %v429_v31 = vmul.f32 %v552_v29, %v423_v30 }
 0x2a8   :  { %v431_v33 = vadd.f32 %v429_v31, %v362_v32 }
 0x2aa   :  { %v554_v34 = vpop.eup %553  ;;  %v436_v35 = vadd.f32 %v520_v14, %v431_v33 }
 0x2ab   :  { %v499_v37 = vadd.f32 -1.0, %v554_v34 }
 0x2ac   :  { %v441_v38 = vmul.f32 1.442695, %v436_v35  ;;  %vm438_vm14 = vcmp.gt.f32.partialorder %v436_v35, 0.0 }
 0x2ad   :  { %v445_v39 = vsel %vm437_vm13, %v435_v22, %v499_v37 }
 0x2ae   :  { %447 = vst.msk [vmem:[#allocation2] sm:$0xff] %vm87_vm1, %v445_v39  ;;  %555 = vpow2.f32 %v441_v38 }
 0x2b4   :  { %v556_v36 = vpop.eup %555 }
 0x2b5   :  { %v500_v40 = vadd.f32 -1.0, %v556_v36 }
 0x2b7   :  { %v446_v41 = vsel %vm438_vm14, %v436_v35, %v500_v40 }
 0x2b8   :  { %448 = vst.msk [vmem:[#allocation2 + $0x8] sm:$0xff] %vm87_vm1, %v446_v41 }
 0x2b9   :  { %461 = dma.vmem_to_hbm [thread:$0]  %s454_s9, 256, %s456_s12, [#allocation3], %s588_s13, %s588_s13, %s589_s14  }
 0x2ba   :  { %581 = dma.done.wait [#allocation3], 256  }
 0x2bb   :  { %582 = vsyncadd [#allocation3], 4294967040 }
 0x2bc   :  { %466 = vsyncpa [#allocation3], 1 }

</bundles_post_ra>
